<compile_context>
chip_gen: v5e
topology: v5e:2x2
jax: 0.10.0
libtpu: 0.0.40
codegen_flags: <defaults>
</compile_context>

<pallas_src>
import math

import jax
import jax.numpy as jnp
from jax.experimental import pallas as pl
from jax.experimental.pallas import tpu as pltpu


def _round_up(x, m):
    return ((x + m - 1) // m) * m


def _pick_tile_m(B):
    """Pick a batch tile: big (512-1024) at large B, divides B when possible,
    and leaves >= 2 grid steps so v7x's 2 TensorCores both get sharded work."""
    if B <= 128:
        # Single tile; sublane-aligned (bf16 intermediates pack 16 sublanes).
        return _round_up(max(B, 8), 16)
    # Prefer the largest power-of-two tile that divides B AND gives >= 2 tiles.
    for t in (1024, 512, 256, 128):
        if B % t == 0 and B // t >= 2:
            return t
    # Irregular batch: fall back to a 128-multiple tile with modest pad waste.
    if B >= 2048:
        return 512
    if B >= 512:
        return 256
    return 128


# ----------------------------------------------------------------------------
# Pallas kernel: one batch tile of the fused fc2 MLP
#   out = (relu(relu(x @ W1 + b1) @ W2 + b2)) @ W3 + b3
# x arrives f32 and is cast to bf16 in-kernel; weights are bf16; accumulation
# is f32; activations are re-cast to bf16 between layers so every dot runs the
# MXU's native bf16 path. Output is stored bf16 (lane-padded to 128).
# ----------------------------------------------------------------------------
def _fc2_kernel(x_ref, w1_ref, b1_ref, w2_ref, b2_ref, w3_ref, b3_ref, o_ref):
    x = x_ref[...].astype(jnp.bfloat16)                              # (tm, D_in)
    h1 = jnp.dot(x, w1_ref[...], preferred_element_type=jnp.float32) + b1_ref[...]
    h1 = jnp.maximum(h1, 0.0).astype(jnp.bfloat16)                   # ReLU
    h2 = jnp.dot(h1, w2_ref[...], preferred_element_type=jnp.float32) + b2_ref[...]
    h2 = jnp.maximum(h2, 0.0).astype(jnp.bfloat16)                   # ReLU
    o = jnp.dot(h2, w3_ref[...], preferred_element_type=jnp.float32) + b3_ref[...]
    o_ref[...] = o.astype(o_ref.dtype)                               # bf16 store


def fc2_forward(x_nchw, params, output_size):
    """fc2 NN forward pass via a fused Pallas kernel (batch-tiled grid).

    x_nchw: (B, C, H, W) float32
    params: dict with bf16 weights w1, w2, w3 (w3/b3 lane-padded to 128) and
            f32 biases b1, b2, b3. Logical output columns are the first
            `output_size` columns of the padded last layer.
    Returns (B, output_size) bf16 logits.
    """
    B = x_nchw.shape[0]
    x_flat = x_nchw.reshape(B, -1)                  # nn.Flatten (row-major, NCHW)

    w1, b1 = params["w1"], params["b1"]
    w2, b2 = params["w2"], params["b2"]
    w3, b3 = params["w3"], params["b3"]

    D_in = x_flat.shape[1]
    H = w1.shape[1]
    O_pad = w3.shape[1]

    TILE_M = _pick_tile_m(B)
    grid_m = pl.cdiv(B, TILE_M)
    B_pad = grid_m * TILE_M

    x_in = x_flat
    if B_pad != B:                                  # only pads when tile doesn't divide B
        x_in = jnp.pad(x_in, ((0, B_pad - B), (0, 0)))

    flops = 2 * B_pad * (D_in * H + H * H + H * O_pad)
    bytes_accessed = (
        B_pad * D_in * 4                            # x (f32 in)
        + B_pad * O_pad * 2                         # out (bf16)
        + (D_in * H + H * H + H * O_pad) * 2        # bf16 weights (DMA'd once)
        + (2 * H + O_pad) * 4                       # f32 biases
    )

    out = pl.pallas_call(
        _fc2_kernel,
        out_shape=jax.ShapeDtypeStruct((B_pad, O_pad), jnp.bfloat16),
        grid=(grid_m,),
        in_specs=[
            pl.BlockSpec((TILE_M, D_in), lambda i: (i, 0)),   # x: tiled over batch
            pl.BlockSpec((D_in, H), lambda i: (0, 0)),        # w1: VMEM-resident
            pl.BlockSpec((1, H), lambda i: (0, 0)),           # b1
            pl.BlockSpec((H, H), lambda i: (0, 0)),           # w2
            pl.BlockSpec((1, H), lambda i: (0, 0)),           # b2
            pl.BlockSpec((H, O_pad), lambda i: (0, 0)),       # w3 (lane-padded)
            pl.BlockSpec((1, O_pad), lambda i: (0, 0)),       # b3 (lane-padded)
        ],
        out_specs=pl.BlockSpec((TILE_M, O_pad), lambda i: (i, 0)),
        compiler_params=pltpu.CompilerParams(
            dimension_semantics=("parallel",),                # v7x: shard tiles on 2 TCs
        ),
        cost_estimate=pl.CostEstimate(
            flops=flops, bytes_accessed=bytes_accessed, transcendentals=0
        ),
    )(x_in, w1, b1, w2, b2, w3, b3)

    return out[:B, :output_size]


# ----------------------------------------------------------------------------
# Deterministic parameter init (mimics nn.Linear: U(-1/sqrt(fan_in),
# 1/sqrt(fan_in)) for weight and bias). Weights are stored in bf16 (MXU-native,
# halves weight-DMA bytes); biases stay f32. Padding columns of the last layer
# are zero and never affect the logical outputs.
# ----------------------------------------------------------------------------
def init_params(key, input_size, hidden_size, output_size, out_pad):
    ks = jax.random.split(key, 6)

    def linear(kw, kb, fan_in, fan_out):
        bound = 1.0 / math.sqrt(fan_in)
        w = jax.random.uniform(kw, (fan_in, fan_out), jnp.float32, -bound, bound)
        b = jax.random.uniform(kb, (1, fan_out), jnp.float32, -bound, bound)
        return w, b

    w1, b1 = linear(ks[0], ks[1], input_size, hidden_size)
    w2, b2 = linear(ks[2], ks[3], hidden_size, hidden_size)
    w3, b3 = linear(ks[4], ks[5], hidden_size, output_size)

    # Pad final layer out to a lane-friendly width (extra cols are zero) so the
    # kernel's output block is 128-wide -> unmasked vector stores.
    w3 = jnp.pad(w3, ((0, 0), (0, out_pad - output_size)))
    b3 = jnp.pad(b3, ((0, 0), (0, out_pad - output_size)))

    return {
        "w1": w1.astype(jnp.bfloat16), "b1": b1,
        "w2": w2.astype(jnp.bfloat16), "b2": b2,
        "w3": w3.astype(jnp.bfloat16), "b3": b3,
    }


if __name__ == "__main__":
    # Config consistent with NN(dataset, input_shape=(4,16,16), output_size=10,
    # hidden_size=128, activation='relu', architecture='fc2', ...)
    B, C, Hs, Ws = 2, 4, 16, 16
    input_size = C * Hs * Ws            # 1024
    hidden_size = 128                   # power of 2 >= 16
    output_size = 10
    out_pad = 128                       # lane-aligned padding for last layer

    key = jax.random.PRNGKey(0)
    k_x, k_p = jax.random.split(key)
    x = jax.random.normal(k_x, (B, C, Hs, Ws), jnp.float32)
    params = init_params(k_p, input_size, hidden_size, output_size, out_pad)

    out = fc2_forward(x, params, output_size)
    out = jax.block_until_ready(out)

    # Pure-JAX reference with identical bf16-input / f32-accumulate semantics.
    # TODO(synk): intermediates are bf16, so parity with a pure-f32 PyTorch fc2
    # holds only to ~1e-2; use f32 weights/activations if bit-level parity matters.
    f32 = jnp.float32
    xf = x.reshape(B, -1).astype(jnp.bfloat16).astype(f32)
    w1 = params["w1"].astype(f32); w2 = params["w2"].astype(f32)
    w3 = params["w3"].astype(f32)
    h1 = jnp.maximum(xf @ w1 + params["b1"], 0.0).astype(jnp.bfloat16).astype(f32)
    h2 = jnp.maximum(h1 @ w2 + params["b2"], 0.0).astype(jnp.bfloat16).astype(f32)
    ref = (h2 @ w3 + params["b3"]).astype(jnp.bfloat16)[:, :output_size]

    assert out.shape == (B, output_size)
    assert jnp.allclose(out.astype(f32), ref.astype(f32), atol=2e-2, rtol=2e-2), (
        float(jnp.max(jnp.abs(out.astype(f32) - ref.astype(f32))))
    )

    print("KERNEL_OK")
</pallas_src>

<mosaic_0001>
module attributes {stable_mosaic.version = 11 : i64} {
  func.func @_fc2_kernel(%arg0: i32, %arg1: memref<16x1024xf32, #tpu.memory_space<vmem>>, %arg2: memref<1024x128xbf16, #tpu.memory_space<vmem>>, %arg3: memref<1x128xf32, #tpu.memory_space<vmem>>, %arg4: memref<128x128xbf16, #tpu.memory_space<vmem>>, %arg5: memref<1x128xf32, #tpu.memory_space<vmem>>, %arg6: memref<128x128xbf16, #tpu.memory_space<vmem>>, %arg7: memref<1x128xf32, #tpu.memory_space<vmem>>, %arg8: memref<16x128xbf16, #tpu.memory_space<vmem>>) attributes {dimension_semantics = [#tpu.dimension_semantics<parallel>], iteration_bounds = array<i64: 1>, scalar_prefetch = 0 : i64, scratch_operands = 0 : i64, tpu.core_type = #tpu.core_type<tc>, window_params = [{transform_indices = @transform_0, window_bounds = array<i64: 16, 1024>}, {pipeline_mode = #tpu.pipeline_mode<synchronous>, transform_indices = @transform_1, window_bounds = array<i64: 1024, 128>}, {pipeline_mode = #tpu.pipeline_mode<synchronous>, transform_indices = @transform_2, window_bounds = array<i64: 1, 128>}, {pipeline_mode = #tpu.pipeline_mode<synchronous>, transform_indices = @transform_3, window_bounds = array<i64: 128, 128>}, {pipeline_mode = #tpu.pipeline_mode<synchronous>, transform_indices = @transform_4, window_bounds = array<i64: 1, 128>}, {pipeline_mode = #tpu.pipeline_mode<synchronous>, transform_indices = @transform_5, window_bounds = array<i64: 128, 128>}, {pipeline_mode = #tpu.pipeline_mode<synchronous>, transform_indices = @transform_6, window_bounds = array<i64: 1, 128>}, {transform_indices = @transform_7, window_bounds = array<i64: 16, 128>}]} {
    %c0 = arith.constant 0 : index
    %c0_0 = arith.constant 0 : index
    %0 = vector.load %arg1[%c0, %c0_0] : memref<16x1024xf32, #tpu.memory_space<vmem>>, vector<16x1024xf32>
    %1 = arith.truncf %0 : vector<16x1024xf32> to vector<16x1024xbf16>
    %c0_1 = arith.constant 0 : index
    %c0_2 = arith.constant 0 : index
    %2 = vector.load %arg2[%c0_1, %c0_2] : memref<1024x128xbf16, #tpu.memory_space<vmem>>, vector<1024x128xbf16>
    %cst = arith.constant dense<0.000000e+00> : vector<16x128xf32>
    %3 = tpu.matmul %1, %2, %cst {dimension_numbers = #tpu.dot_dimension_numbers<[1], [0], [0], [1], [0, 0, 1, 1], [], []>} : vector<16x1024xbf16>, vector<1024x128xbf16>, vector<16x128xf32> -> vector<16x128xf32>
    %c0_3 = arith.constant 0 : index
    %c0_4 = arith.constant 0 : index
    %4 = vector.load %arg3[%c0_3, %c0_4] : memref<1x128xf32, #tpu.memory_space<vmem>>, vector<1x128xf32>
    %5 = vector.broadcast %4 : vector<1x128xf32> to vector<16x128xf32>
    %6 = arith.addf %3, %5 : vector<16x128xf32>
    %cst_5 = arith.constant 0.000000e+00 : f32
    %7 = vector.broadcast %cst_5 : f32 to vector<16x128xf32>
    %8 = arith.maximumf %6, %7 : vector<16x128xf32>
    %9 = arith.truncf %8 : vector<16x128xf32> to vector<16x128xbf16>
    %c0_6 = arith.constant 0 : index
    %c0_7 = arith.constant 0 : index
    %10 = vector.load %arg4[%c0_6, %c0_7] : memref<128x128xbf16, #tpu.memory_space<vmem>>, vector<128x128xbf16>
    %cst_8 = arith.constant dense<0.000000e+00> : vector<16x128xf32>
    %11 = tpu.matmul %9, %10, %cst_8 {dimension_numbers = #tpu.dot_dimension_numbers<[1], [0], [0], [1], [0, 0, 1, 1], [], []>} : vector<16x128xbf16>, vector<128x128xbf16>, vector<16x128xf32> -> vector<16x128xf32>
    %c0_9 = arith.constant 0 : index
    %c0_10 = arith.constant 0 : index
    %12 = vector.load %arg5[%c0_9, %c0_10] : memref<1x128xf32, #tpu.memory_space<vmem>>, vector<1x128xf32>
    %13 = vector.broadcast %12 : vector<1x128xf32> to vector<16x128xf32>
    %14 = arith.addf %11, %13 : vector<16x128xf32>
    %cst_11 = arith.constant 0.000000e+00 : f32
    %15 = vector.broadcast %cst_11 : f32 to vector<16x128xf32>
    %16 = arith.maximumf %14, %15 : vector<16x128xf32>
    %17 = arith.truncf %16 : vector<16x128xf32> to vector<16x128xbf16>
    %c0_12 = arith.constant 0 : index
    %c0_13 = arith.constant 0 : index
    %18 = vector.load %arg6[%c0_12, %c0_13] : memref<128x128xbf16, #tpu.memory_space<vmem>>, vector<128x128xbf16>
    %cst_14 = arith.constant dense<0.000000e+00> : vector<16x128xf32>
    %19 = tpu.matmul %17, %18, %cst_14 {dimension_numbers = #tpu.dot_dimension_numbers<[1], [0], [0], [1], [0, 0, 1, 1], [], []>} : vector<16x128xbf16>, vector<128x128xbf16>, vector<16x128xf32> -> vector<16x128xf32>
    %c0_15 = arith.constant 0 : index
    %c0_16 = arith.constant 0 : index
    %20 = vector.load %arg7[%c0_15, %c0_16] : memref<1x128xf32, #tpu.memory_space<vmem>>, vector<1x128xf32>
    %21 = vector.broadcast %20 : vector<1x128xf32> to vector<16x128xf32>
    %22 = arith.addf %19, %21 : vector<16x128xf32>
    %23 = arith.truncf %22 : vector<16x128xf32> to vector<16x128xbf16>
    %c0_17 = arith.constant 0 : index
    %c0_18 = arith.constant 0 : index
    %24 = vector.load %arg8[%c0_17, %c0_18] : memref<16x128xbf16, #tpu.memory_space<vmem>>, vector<16x128xbf16>
    tpu.vector_store %arg8[%c0_17, %c0_18], %23 {strides = array<i32>} : memref<16x128xbf16, #tpu.memory_space<vmem>>, vector<16x128xbf16>,
    return
  }
  func.func @transform_0(%arg0: i32) -> (i32, i32) {
    %c0_i32 = arith.constant 0 : i32
    %c0_i32_0 = arith.constant 0 : i32
    return %arg0, %c0_i32 : i32, i32
  }
  func.func @transform_1(%arg0: i32) -> (i32, i32) {
    %c0_i32 = arith.constant 0 : i32
    %c0_i32_0 = arith.constant 0 : i32
    %c0_i32_1 = arith.constant 0 : i32
    return %c0_i32, %c0_i32_0 : i32, i32
  }
  func.func @transform_2(%arg0: i32) -> (i32, i32) {
    %c0_i32 = arith.constant 0 : i32
    %c0_i32_0 = arith.constant 0 : i32
    %c0_i32_1 = arith.constant 0 : i32
    return %c0_i32, %c0_i32_0 : i32, i32
  }
  func.func @transform_3(%arg0: i32) -> (i32, i32) {
    %c0_i32 = arith.constant 0 : i32
    %c0_i32_0 = arith.constant 0 : i32
    %c0_i32_1 = arith.constant 0 : i32
    return %c0_i32, %c0_i32_0 : i32, i32
  }
  func.func @transform_4(%arg0: i32) -> (i32, i32) {
    %c0_i32 = arith.constant 0 : i32
    %c0_i32_0 = arith.constant 0 : i32
    %c0_i32_1 = arith.constant 0 : i32
    return %c0_i32, %c0_i32_0 : i32, i32
  }
  func.func @transform_5(%arg0: i32) -> (i32, i32) {
    %c0_i32 = arith.constant 0 : i32
    %c0_i32_0 = arith.constant 0 : i32
    %c0_i32_1 = arith.constant 0 : i32
    return %c0_i32, %c0_i32_0 : i32, i32
  }
  func.func @transform_6(%arg0: i32) -> (i32, i32) {
    %c0_i32 = arith.constant 0 : i32
    %c0_i32_0 = arith.constant 0 : i32
    %c0_i32_1 = arith.constant 0 : i32
    return %c0_i32, %c0_i32_0 : i32, i32
  }
  func.func @transform_7(%arg0: i32) -> (i32, i32) {
    %c0_i32 = arith.constant 0 : i32
    %c0_i32_0 = arith.constant 0 : i32
    return %arg0, %c0_i32 : i32, i32
  }
}

</mosaic_0001>

<bundles_post_ra>
// kernel: tpu_custom_call.1
= control target key start
LH: loop header
LB: loop body
LE: loop exit
PB: predicated region body
PF: predicated region fallthrough
CT: control target
= control target key end

     0   :  { %12 = vsyncpa [#allocation3], 0  ;;  %s1566_s0 = inlined_call_operand.hbm [shape: f32[16,1024], index: 0, kind: input, shape index: {}]   ;;  %s1567_s1 = inlined_call_operand.hbm [shape: bf16[1024,128], index: 1, kind: input, shape index: {}]   ;;  %s1568_s2 = inlined_call_operand.vmem [shape: f32[1,128], index: 2, kind: input, shape index: {}]   ;;  %s1569_s3 = inlined_call_operand.hbm [shape: bf16[128,128], index: 3, kind: input, shape index: {}]   ;;  %s1570_s4 = inlined_call_operand.vmem [shape: f32[1,128], index: 4, kind: input, shape index: {}]   ;;  %s1571_s5 = inlined_call_operand.hbm [shape: bf16[128,128], index: 5, kind: input, shape index: {}]   ;;  %s1572_s6 = inlined_call_operand.vmem [shape: f32[1,128], index: 6, kind: input, shape index: {}]   ;;  %s1573_s7 = inlined_call_operand.hbm [shape: bf16[16,128], index: 7, kind: output, shape index: {}]  }
   0x1   :  { %13 = vsyncpa [#allocation6], 0 }
   0x2   :  { %14 = vsyncpa [#allocation9], 0  ;;  %s33_s26 = sshll.u32 %s1567_s1, 4  ;;  %s34_s26 = int_to_ptr.hbm [resolvable:$true] %s33_s26 }
   0x3   :  { %15 = vsyncpa [#allocation4], 0  ;;  %s1481_s27 = smov [#allocation5]   ;;  %s20_s8 = sshll.u32 %s1566_s0, 4  ;;  %s21_s8 = int_to_ptr.hbm [resolvable:$true] %s20_s8 }
   0x4   :  { %s35_s28 = sshll.u32 %s1481_s27, 4  ;;  %s1482_s9 = smov 64   ;;  %s36_s28 = int_to_ptr.vmem [resolvable:$true] %s35_s28 }
   0x5   :  { %s1483_s10 = smov 4   ;;  %s1484_s11 = smov [#allocation2]  }
   0x6   :  { %41 = dma.hbm_to_vmem [thread:$0]  %s34_s26, 8192, %s36_s28, [#allocation6], %s1482_s9, %s1482_s9, %s1483_s10  }
   0x7   :  { %s22_s12 = sshll.u32 %s1484_s11, 4  ;;  %s48_s14 = sshll.u32 %s1569_s3, 4  ;;  %s23_s12 = int_to_ptr.vmem [resolvable:$true] %s22_s12  ;;  %s49_s14 = int_to_ptr.hbm [resolvable:$true] %s48_s14 }
   0x8   :  { %s1485_s15 = smov 1024   ;;  %s1486_s16 = smov [#allocation7]  }
   0x9   :  { %28 = dma.hbm_to_vmem [thread:$0]  %s21_s8, 2048, %s23_s12, [#allocation3], %s1485_s15, %s1485_s15, %s1482_s9  }
   0xa   :  { %s50_s0 = sshll.u32 %s1486_s16, 4  ;;  %s63_s19 = sshll.u32 %s1571_s5, 4  ;;  %s51_s0 = int_to_ptr.vmem [resolvable:$true] %s50_s0  ;;  %s64_s19 = int_to_ptr.hbm [resolvable:$true] %s63_s19 }
   0xb   :  { %56 = dma.hbm_to_vmem [thread:$0]  %s49_s14, 1024, %s51_s0, [#allocation6], %s1482_s9, %s1482_s9, %s1483_s10  }
   0xc   :  { %s1487_s20 = smov [#allocation8]  }
   0xd   :  { %s65_s21 = sshll.u32 %s1487_s20, 4  ;;  %s66_s21 = int_to_ptr.vmem [resolvable:$true] %s65_s21 }
   0xe   :  { %71 = dma.hbm_to_vmem [thread:$0]  %s64_s19, 1024, %s66_s21, [#allocation9], %s1482_s9, %s1482_s9, %s1483_s10  }
   0xf   :  { %1473 = dma.done.wait [#allocation3], 2048  }
  0x10   :  { %1474 = vsyncadd [#allocation3], 4294965248 }
  0x11   :  { %1475 = dma.done.wait [#allocation6], 9216  }
  0x12   :  { %1476 = vsyncadd [#allocation6], 4294958080 }
  0x13   :  { %1477 = dma.done.wait [#allocation9], 1024  }
  0x14   :  { %1478 = vsyncadd [#allocation9], 4294966272  ;;  %v1264_v0 = vld [vmem:[#allocation5 + $0x38] sm:$0xff]  ;;  %v1263_v4 = vld [vmem:[#allocation5 + $0x30] sm:$0xff]  ;;  %s1488_s25 = smov [#allocation10]   ;;  %s922_s29 = sshll.u32 %s1573_s7, 4  ;;  %s923_s29 = int_to_ptr.hbm [resolvable:$true] %s922_s29 }
  0x15   :  { %v1272_v1 = vld [vmem:[#allocation5 + $0x78] sm:$0xff]  ;;  %630 = vmatpush.bf16.msra.mxu0 %v1264_v0  ;;  %v1271_v5 = vld [vmem:[#allocation5 + $0x70] sm:$0xff]  ;;  %v1262_v8 = vld [vmem:[#allocation5 + $0x28] sm:$0xff]  ;;  %s920_s26 = sshll.u32 %s1488_s25, 4  ;;  %s921_s26 = int_to_ptr.vmem [resolvable:$true] %s920_s26 }
  0x16   :  { %v1280_v2 = vld [vmem:[#allocation5 + $0xb8] sm:$0xff]  ;;  %644 = vmatpush.bf16.msra.mxu1 %v1272_v1  ;;  %v1279_v6 = vld [vmem:[#allocation5 + $0xb0] sm:$0xff]  ;;  %v1270_v9 = vld [vmem:[#allocation5 + $0x68] sm:$0xff] }
  0x17   :  { %v1288_v3 = vld [vmem:[#allocation5 + $0xf8] sm:$0xff]  ;;  %658 = vmatpush.bf16.msra.mxu2 %v1280_v2  ;;  %v1287_v7 = vld [vmem:[#allocation5 + $0xf0] sm:$0xff]  ;;  %v1278_v10 = vld [vmem:[#allocation5 + $0xa8] sm:$0xff] }
  0x18   :  { %672 = vmatpush.bf16.msra.mxu3 %v1288_v3  ;;  %v1286_v11 = vld [vmem:[#allocation5 + $0xe8] sm:$0xff]  ;;  %v1261_v12 = vld [vmem:[#allocation5 + $0x20] sm:$0xff]  ;;  %v1260_v16 = vld [vmem:[#allocation5 + $0x18] sm:$0xff] }
  0x19   :  { %631 = vmatpush.bf16.msra.mxu0 %v1263_v4  ;;  %v1269_v13 = vld [vmem:[#allocation5 + $0x60] sm:$0xff]  ;;  %v1268_v17 = vld [vmem:[#allocation5 + $0x58] sm:$0xff]  ;;  %v1259_v20 = vld [vmem:[#allocation5 + $0x10] sm:$0xff] }
  0x1a   :  { %645 = vmatpush.bf16.msra.mxu1 %v1271_v5  ;;  %v1277_v14 = vld [vmem:[#allocation5 + $0xa0] sm:$0xff]  ;;  %v1276_v18 = vld [vmem:[#allocation5 + $0x98] sm:$0xff]  ;;  %v1267_v21 = vld [vmem:[#allocation5 + $0x50] sm:$0xff] }
  0x1b   :  { %659 = vmatpush.bf16.msra.mxu2 %v1279_v6  ;;  %v1285_v15 = vld [vmem:[#allocation5 + $0xe0] sm:$0xff]  ;;  %v1284_v19 = vld [vmem:[#allocation5 + $0xd8] sm:$0xff]  ;;  %v1275_v22 = vld [vmem:[#allocation5 + $0x90] sm:$0xff] }
  0x1c   :  { %673 = vmatpush.bf16.msra.mxu3 %v1287_v7  ;;  %v1283_v23 = vld [vmem:[#allocation5 + $0xd0] sm:$0xff]  ;;  %v1258_v24 = vld [vmem:[#allocation5 + $0x8] sm:$0xff]  ;;  %v1257_v28 = vld [vmem:[#allocation5] sm:$0xff] }
  0x1d   :  { %632 = vmatpush.bf16.msra.mxu0 %v1262_v8  ;;  %v1266_v25 = vld [vmem:[#allocation5 + $0x48] sm:$0xff]  ;;  %v1265_v29 = vld [vmem:[#allocation5 + $0x40] sm:$0xff]  ;;  %v1296_v32 = vld [vmem:[#allocation5 + $0x138] sm:$0xff] }
  0x1e   :  { %646 = vmatpush.bf16.msra.mxu1 %v1270_v9  ;;  %v1274_v26 = vld [vmem:[#allocation5 + $0x88] sm:$0xff]  ;;  %v1273_v30 = vld [vmem:[#allocation5 + $0x80] sm:$0xff]  ;;  %v1304_v33 = vld [vmem:[#allocation5 + $0x178] sm:$0xff] }
  0x1f   :  { %660 = vmatpush.bf16.msra.mxu2 %v1278_v10  ;;  %v1282_v27 = vld [vmem:[#allocation5 + $0xc8] sm:$0xff]  ;;  %v1281_v31 = vld [vmem:[#allocation5 + $0xc0] sm:$0xff]  ;;  %v92_v34 = vld [vmem:[#allocation2 + $0x10] sm:$0xff] }
  0x20   :  { %674 = vmatpush.bf16.msra.mxu3 %v1286_v11  ;;  %v100_v35 = vld [vmem:[#allocation2 + $0x50] sm:$0xff]  ;;  %v90_v36 = vld [vmem:[#allocation2] sm:$0xff]  ;;  %v93_v38 = vld [vmem:[#allocation2 + $0x18] sm:$0xff] }
  0x21   :  { %633 = vmatpush.bf16.msra.mxu0 %v1261_v12  ;;  %v98_v37 = vld [vmem:[#allocation2 + $0x40] sm:$0xff]  ;;  %v101_v39 = vld [vmem:[#allocation2 + $0x58] sm:$0xff]  ;;  %v91_v40 = vld [vmem:[#allocation2 + $0x8] sm:$0xff]  ;;  %v108_v44 = vpack.c.bf16 %v100_v35, %v92_v34 }
  0x22   :  { %647 = vmatpush.bf16.msra.mxu1 %v1269_v13  ;;  %v99_v41 = vld [vmem:[#allocation2 + $0x48] sm:$0xff]  ;;  %v1312_v42 = vld [vmem:[#allocation5 + $0x1b8] sm:$0xff]  ;;  %v106_v45 = vpack.c.bf16 %v98_v37, %v90_v36  ;;  %v109_v46 = vpack.c.bf16 %v101_v39, %v93_v38  ;;  %v1295_v48 = vld [vmem:[#allocation5 + $0x130] sm:$0xff] }
  0x23   :  { %661 = vmatpush.bf16.msra.mxu2 %v1277_v14  ;;  %v1320_v43 = vld [vmem:[#allocation5 + $0x1f8] sm:$0xff]  ;;  %v107_v47 = vpack.c.bf16 %v99_v41, %v91_v40  ;;  %v1303_v49 = vld [vmem:[#allocation5 + $0x170] sm:$0xff]  ;;  %v1294_v52 = vld [vmem:[#allocation5 + $0x128] sm:$0xff] }
  0x24   :  { %675 = vmatpush.bf16.msra.mxu3 %v1285_v15  ;;  %v1311_v50 = vld [vmem:[#allocation5 + $0x1b0] sm:$0xff]  ;;  %v1302_v53 = vld [vmem:[#allocation5 + $0x168] sm:$0xff]  ;;  %v1293_v56 = vld [vmem:[#allocation5 + $0x120] sm:$0xff] }
  0x25   :  { %634 = vmatpush.bf16.msra.mxu0 %v1260_v16  ;;  %v1319_v51 = vld [vmem:[#allocation5 + $0x1f0] sm:$0xff]  ;;  %v1310_v54 = vld [vmem:[#allocation5 + $0x1a8] sm:$0xff]  ;;  %v1301_v57 = vld [vmem:[#allocation5 + $0x160] sm:$0xff] }
  0x26   :  { %648 = vmatpush.bf16.msra.mxu1 %v1268_v17  ;;  %v1318_v55 = vld [vmem:[#allocation5 + $0x1e8] sm:$0xff]  ;;  %v1309_v58 = vld [vmem:[#allocation5 + $0x1a0] sm:$0xff]  ;;  %v1292_v60 = vld [vmem:[#allocation5 + $0x118] sm:$0xff] }
  0x27   :  { %662 = vmatpush.bf16.msra.mxu2 %v1276_v18  ;;  %v1317_v59 = vld [vmem:[#allocation5 + $0x1e0] sm:$0xff]  ;;  %v1300_v61 = vld [vmem:[#allocation5 + $0x158] sm:$0xff]  ;;  %v1291_v0 = vld [vmem:[#allocation5 + $0x110] sm:$0xff] }
  0x28   :  { %676 = vmatpush.bf16.msra.mxu3 %v1284_v19  ;;  %v1308_v62 = vld [vmem:[#allocation5 + $0x198] sm:$0xff]  ;;  %v1299_v1 = vld [vmem:[#allocation5 + $0x150] sm:$0xff]  ;;  %v1290_v4 = vld [vmem:[#allocation5 + $0x108] sm:$0xff] }
  0x29   :  { %635 = vmatpush.bf16.msra.mxu0 %v1259_v20  ;;  %v1316_v63 = vld [vmem:[#allocation5 + $0x1d8] sm:$0xff]  ;;  %v1307_v2 = vld [vmem:[#allocation5 + $0x190] sm:$0xff]  ;;  %v1298_v5 = vld [vmem:[#allocation5 + $0x148] sm:$0xff] }
  0x2a   :  { %649 = vmatpush.bf16.msra.mxu1 %v1267_v21  ;;  %v1315_v3 = vld [vmem:[#allocation5 + $0x1d0] sm:$0xff]  ;;  %v1306_v6 = vld [vmem:[#allocation5 + $0x188] sm:$0xff]  ;;  %v1289_v8 = vld [vmem:[#allocation5 + $0x100] sm:$0xff] }
  0x2b   :  { %663 = vmatpush.bf16.msra.mxu2 %v1275_v22  ;;  %v1314_v7 = vld [vmem:[#allocation5 + $0x1c8] sm:$0xff]  ;;  %v1297_v9 = vld [vmem:[#allocation5 + $0x140] sm:$0xff]  ;;  %v96_v16 = vld [vmem:[#allocation2 + $0x30] sm:$0xff] }
  0x2c   :  { %677 = vmatpush.bf16.msra.mxu3 %v1283_v23  ;;  %v1305_v10 = vld [vmem:[#allocation5 + $0x180] sm:$0xff]  ;;  %v95_v14 = vld [vmem:[#allocation2 + $0x28] sm:$0xff]  ;;  %v104_v17 = vld [vmem:[#allocation2 + $0x70] sm:$0xff] }
  0x2d   :  { %636 = vmatpush.bf16.msra.mxu0 %v1258_v24  ;;  %v1313_v11 = vld [vmem:[#allocation5 + $0x1c0] sm:$0xff]  ;;  %v103_v15 = vld [vmem:[#allocation2 + $0x68] sm:$0xff]  ;;  %v97_v18 = vld [vmem:[#allocation2 + $0x38] sm:$0xff]  ;;  %v112_v22 = vpack.c.bf16 %v104_v17, %v96_v16 }
  0x2e   :  { %650 = vmatpush.bf16.msra.mxu1 %v1266_v25  ;;  %v94_v12 = vld [vmem:[#allocation2 + $0x20] sm:$0xff]  ;;  %v105_v19 = vld [vmem:[#allocation2 + $0x78] sm:$0xff]  ;;  %v111_v21 = vpack.c.bf16 %v103_v15, %v95_v14  ;;  %v1327_v25 = vld [vmem:[#allocation7 + $0x30] sm:$0xff] }
  0x2f   :  { %664 = vmatpush.bf16.msra.mxu2 %v1274_v26  ;;  %v102_v13 = vld [vmem:[#allocation2 + $0x60] sm:$0xff]  ;;  %v113_v23 = vpack.c.bf16 %v105_v19, %v97_v18  ;;  %v1328_v24 = vld [vmem:[#allocation7 + $0x38] sm:$0xff]  ;;  %v1326_v26 = vld [vmem:[#allocation7 + $0x28] sm:$0xff] }
  0x30   :  { %678 = vmatpush.bf16.msra.mxu3 %v1282_v27  ;;  %v110_v20 = vpack.c.bf16 %v102_v13, %v94_v12  ;;  %v1325_v27 = vld [vmem:[#allocation7 + $0x20] sm:$0xff]  ;;  %v1336_v39 = vld [vmem:[#allocation8 + $0x38] sm:$0xff]  ;;  %v1335_v40 = vld [vmem:[#allocation8 + $0x30] sm:$0xff] }
  0x31   :  { %637 = vmatpush.bf16.msra.mxu0 %v1257_v28  ;;  %v1324_v28 = vld [vmem:[#allocation7 + $0x18] sm:$0xff]  ;;  %v1350_v34 = vld [vmem:[%s1568_s2] ss:$0 sm:$0xff] }
  0x32   :  { %651 = vmatpush.bf16.msra.mxu1 %v1265_v29  ;;  %v1323_v29 = vld [vmem:[#allocation7 + $0x10] sm:$0xff]  ;;  %v1351_v13 = vld [vmem:[%s1570_s4] ss:$0 sm:$0xff] }
  0x33   :  { %665 = vmatpush.bf16.msra.mxu2 %v1273_v30 }
  0x34   :  { %679 = vmatpush.bf16.msra.mxu3 %v1281_v31  ;;  %638 = vmatmul.bf16.vlgmr.msra.gmra.mxu0 %v106_v45  ;;  %v1322_v31 = vld [vmem:[#allocation7 + $0x8] sm:$0xff] }
  0x35   :  { %686 = vmatpush.bf16.msrb.mxu0 %v1296_v32  ;;  %652 = vmatmul.bf16.vlgmr.msra.gmra.mxu1 %v107_v47 }
  0x36   :  { %700 = vmatpush.bf16.msrb.mxu1 %v1304_v33  ;;  %666 = vmatmul.bf16.vlgmr.msra.gmra.mxu2 %v108_v44  ;;  %v1321_v33 = vld [vmem:[#allocation7] sm:$0xff]  ;;  %v1334_v44 = vld [vmem:[#allocation8 + $0x28] sm:$0xff] }
  0x37   :  { %714 = vmatpush.bf16.msrb.mxu2 %v1312_v42  ;;  %680 = vmatmul.bf16.vlgmr.msra.gmra.mxu3 %v109_v46 }
  0x38   :  { %728 = vmatpush.bf16.msrb.mxu3 %v1320_v43 }
  0x39   :  { %687 = vmatpush.bf16.msrb.mxu0 %v1295_v48 }
  0x3a   :  { %701 = vmatpush.bf16.msrb.mxu1 %v1303_v49 }
  0x3b   :  { %715 = vmatpush.bf16.msrb.mxu2 %v1311_v50  ;;  %v1333_v50 = vld [vmem:[#allocation8 + $0x20] sm:$0xff] }
  0x3c   :  { %729 = vmatpush.bf16.msrb.mxu3 %v1319_v51 }
  0x3d   :  { %688 = vmatpush.bf16.msrb.mxu0 %v1294_v52 }
  0x3e   :  { %702 = vmatpush.bf16.msrb.mxu1 %v1302_v53 }
  0x3f   :  { %716 = vmatpush.bf16.msrb.mxu2 %v1310_v54 }
  0x40   :  { %730 = vmatpush.bf16.msrb.mxu3 %v1318_v55 }
  0x41   :  { %689 = vmatpush.bf16.msrb.mxu0 %v1293_v56 }
  0x42   :  { %703 = vmatpush.bf16.msrb.mxu1 %v1301_v57 }
  0x43   :  { %717 = vmatpush.bf16.msrb.mxu2 %v1309_v58 }
  0x44   :  { %731 = vmatpush.bf16.msrb.mxu3 %v1317_v59 }
  0x45   :  { %690 = vmatpush.bf16.msrb.mxu0 %v1292_v60 }
  0x46   :  { %704 = vmatpush.bf16.msrb.mxu1 %v1300_v61 }
  0x47   :  { %718 = vmatpush.bf16.msrb.mxu2 %v1308_v62 }
  0x48   :  { %732 = vmatpush.bf16.msrb.mxu3 %v1316_v63 }
  0x49   :  { %691 = vmatpush.bf16.msrb.mxu0 %v1291_v0 }
  0x4a   :  { %705 = vmatpush.bf16.msrb.mxu1 %v1299_v1 }
  0x4b   :  { %719 = vmatpush.bf16.msrb.mxu2 %v1307_v2 }
  0x4c   :  { %733 = vmatpush.bf16.msrb.mxu3 %v1315_v3 }
  0x4d   :  { %692 = vmatpush.bf16.msrb.mxu0 %v1290_v4 }
  0x4e   :  { %706 = vmatpush.bf16.msrb.mxu1 %v1298_v5 }
  0x4f   :  { %720 = vmatpush.bf16.msrb.mxu2 %v1306_v6 }
  0x50   :  { %734 = vmatpush.bf16.msrb.mxu3 %v1314_v7 }
  0x51   :  { %693 = vmatpush.bf16.msrb.mxu0 %v1289_v8  ;;  %v1332_v8 = vld [vmem:[#allocation8 + $0x18] sm:$0xff] }
  0x52   :  { %707 = vmatpush.bf16.msrb.mxu1 %v1297_v9  ;;  %v1331_v9 = vld [vmem:[#allocation8 + $0x10] sm:$0xff] }
  0x53   :  { %721 = vmatpush.bf16.msrb.mxu2 %v1305_v10  ;;  %v1330_v10 = vld [vmem:[#allocation8 + $0x8] sm:$0xff] }
  0x54   :  { %735 = vmatpush.bf16.msrb.mxu3 %v1313_v11  ;;  %694 = vmatmul.bf16.vlgmr.msrb.gmra.mxu0 %v110_v20  ;;  %v1329_v11 = vld [vmem:[#allocation8] sm:$0xff] }
  0x55   :  { %708 = vmatmul.bf16.vlgmr.msrb.gmra.mxu1 %v111_v21  ;;  %813 = vmatpush.bf16.msra.mxu0 %v1328_v24  ;;  %v1352_v21 = vld [vmem:[%s1572_s6] ss:$0 sm:$0xff] }
  0x56   :  { %722 = vmatmul.bf16.vlgmr.msrb.gmra.mxu2 %v112_v22  ;;  %898 = vmatpush.bf16.msra.mxu1 %v1336_v39 }
  0x57   :  { %736 = vmatmul.bf16.vlgmr.msrb.gmra.mxu3 %v113_v23 }
  0x59   :  { %814 = vmatpush.bf16.msra.mxu0 %v1327_v25 }
  0x5a   :  { %899 = vmatpush.bf16.msra.mxu1 %v1335_v40 }
  0x5d   :  { %815 = vmatpush.bf16.msra.mxu0 %v1326_v26 }
  0x5e   :  { %900 = vmatpush.bf16.msra.mxu1 %v1334_v44 }
  0x61   :  { %816 = vmatpush.bf16.msra.mxu0 %v1325_v27 }
  0x62   :  { %901 = vmatpush.bf16.msra.mxu1 %v1333_v50 }
  0x65   :  { %817 = vmatpush.bf16.msra.mxu0 %v1324_v28 }
  0x66   :  { %902 = vmatpush.bf16.msra.mxu1 %v1332_v8 }
  0x69   :  { %818 = vmatpush.bf16.msra.mxu0 %v1323_v29 }
  0x6a   :  { %903 = vmatpush.bf16.msra.mxu1 %v1331_v9 }
  0x6d   :  { %819 = vmatpush.bf16.msra.mxu0 %v1322_v31 }
  0x6e   :  { %904 = vmatpush.bf16.msra.mxu1 %v1330_v10 }
  0x71   :  { %820 = vmatpush.bf16.msra.mxu0 %v1321_v33 }
  0x72   :  { %905 = vmatpush.bf16.msra.mxu1 %v1329_v11 }
  0xb1   :  { %v639_v30 = vpop.f32.mrf.mxu0 }
  0xb2   :  { %v653_v32 = vpop.f32.mrf.mxu1  ;;  %v640_v37 = vadd.f32 %v1350_v34, %v639_v30 }
  0xb4   :  { %v654_v42 = vadd.f32 %v653_v32, %v640_v37 }
  0xb9   :  { %v667_v35 = vpop.f32.mrf.mxu2  ;;  %v641_v38 = vpop.f32.mrf.mxu0 }
  0xba   :  { %v681_v36 = vpop.f32.mrf.mxu3  ;;  %v655_v41 = vpop.f32.mrf.mxu1  ;;  %v642_v43 = vadd.f32 %v1350_v34, %v641_v38  ;;  %v668_v47 = vadd.f32 %v667_v35, %v654_v42 }
  0xbc   :  { %v656_v48 = vadd.f32 %v655_v41, %v642_v43  ;;  %v682_v52 = vadd.f32 %v681_v36, %v668_v47 }
  0xc1   :  { %v669_v45 = vpop.f32.mrf.mxu2 }
  0xc2   :  { %v683_v46 = vpop.f32.mrf.mxu3  ;;  %v670_v53 = vadd.f32 %v669_v45, %v656_v48 }
  0xc4   :  { %v684_v57 = vadd.f32 %v683_v46, %v670_v53 }
  0xd1   :  { %v695_v49 = vpop.f32.mrf.mxu0 }
  0xd2   :  { %v709_v51 = vpop.f32.mrf.mxu1  ;;  %v696_v54 = vadd.f32 %v695_v49, %v682_v52 }
  0xd4   :  { %v710_v59 = vadd.f32 %v709_v51, %v696_v54 }
  0xd9   :  { %v723_v55 = vpop.f32.mrf.mxu2  ;;  %v697_v58 = vpop.f32.mrf.mxu0 }
  0xda   :  { %v737_v56 = vpop.f32.mrf.mxu3  ;;  %v698_v60 = vadd.f32 %v697_v58, %v684_v57  ;;  %v724_v61 = vadd.f32 %v723_v55, %v710_v59  ;;  %v711_v62 = vpop.f32.mrf.mxu1 }
  0xdc   :  { %v712_v63 = vadd.f32 %v711_v62, %v698_v60  ;;  %v738_v1 = vadd.f32 %v737_v56, %v724_v61 }
  0xde   :  { %v742_v5 = vmax.f32 %v738_v1, 0.0 }
  0xe1   :  { %v725_v0 = vpop.f32.mrf.mxu2 }
  0xe2   :  { %v726_v2 = vadd.f32 %v725_v0, %v712_v63  ;;  %v739_v3 = vpop.f32.mrf.mxu3 }
  0xe4   :  { %v740_v4 = vadd.f32 %v739_v3, %v726_v2 }
  0xe6   :  { %v743_v6 = vmax.f32 %v740_v4, 0.0 }
  0xe8   :  { %v744_v7 = vpack.c.bf16 %v743_v6, %v742_v5 }
  0xea   :  { %821 = vmatmul.bf16.vlgmr.msra.gmra.mxu0 %v744_v7 }
 0x167   :  { %v822_v12 = vpop.f32.mrf.mxu0 }
 0x168   :  { %v823_v14 = vadd.f32 %v1351_v13, %v822_v12 }
 0x16a   :  { %v827_v17 = vmax.f32 %v823_v14, 0.0 }
 0x16f   :  { %v824_v15 = vpop.f32.mrf.mxu0 }
 0x170   :  { %v825_v16 = vadd.f32 %v1351_v13, %v824_v15 }
 0x172   :  { %v828_v18 = vmax.f32 %v825_v16, 0.0 }
 0x174   :  { %v829_v19 = vpack.c.bf16 %v828_v18, %v827_v17 }
 0x176   :  { %906 = vmatmul.bf16.vlgmr.msra.gmra.mxu1 %v829_v19 }
 0x1f3   :  { %v907_v20 = vpop.f32.mrf.mxu1 }
 0x1f4   :  { %v908_v23 = vadd.f32 %v1352_v21, %v907_v20 }
 0x1fb   :  { %v909_v22 = vpop.f32.mrf.mxu1 }
 0x1fc   :  { %v910_v24 = vadd.f32 %v1352_v21, %v909_v22 }
 0x1fe   :  { %v1340_v25 = vpack.c.bf16 %v910_v24, %v908_v23 }
 0x200   :  { %1341 = vst [vmem:[#allocation10] sm:$0xff] %v1340_v25  }
 0x201   :  { %928 = dma.vmem_to_hbm [thread:$0]  %s921_s26, 128, %s923_s29, [#allocation4], %s1482_s9, %s1482_s9, %s1483_s10  }
 0x202   :  { %1479 = dma.done.wait [#allocation4], 128  }
 0x203   :  { %1480 = vsyncadd [#allocation4], 4294967168 }
 0x204   :  { %933 = vsyncpa [#allocation3], 1 }
 0x205   :  { %934 = vsyncpa [#allocation6], 1 }
 0x206   :  { %935 = vsyncpa [#allocation9], 1 }
 0x207   :  { %936 = vsyncpa [#allocation4], 1 }

</bundles_post_ra>
